<compile_context>
chip_gen: v5e
topology: v5e:2x2
jax: 0.10.0
libtpu: 0.0.40
codegen_flags: <defaults>
</compile_context>

<pallas_src>
import jax
import jax.numpy as jnp
from jax.experimental import pallas as pl
from jax.experimental.pallas import tpu as pltpu


def _leaky_relu(x, slope=0.1):
    return jnp.where(x > 0, x, slope * x)


def box_encoder_kernel(x_ref, w1_ref, b1_ref, w2_ref, b2_ref, o_ref):
    # Linear 1 on the MXU; f32 accumulation regardless of the input dtype.
    h = jnp.dot(x_ref[...], w1_ref[...], preferred_element_type=jnp.float32)
    h = h + b1_ref[...].astype(jnp.float32)
    # mlp1's LeakyReLU(0.1) followed by forward()'s extra F.leaky_relu(0.1),
    # fused into one VPU select+mul (0.1 * 0.1 = 0.01 on the negative branch).
    h = jnp.where(h > 0, h, 0.01 * h)

    # Linear 2 on the MXU + LeakyReLU(0.1).
    out = jnp.dot(h, w2_ref[...], preferred_element_type=jnp.float32)
    out = out + b2_ref[...].astype(jnp.float32)
    out = jnp.where(out > 0, out, 0.1 * out)

    o_ref[...] = out.astype(o_ref.dtype)


def _min_row_multiple(dtype):
    # Sublane packing: f32 tiles need rows % 8 == 0, bf16 rows % 16 == 0.
    return 16 if dtype == jnp.bfloat16 else 8


def _pick_tile_b(B, dtype):
    """Pick a batch tile: ~1024 rows, aligned, and >= 2 grid steps when possible."""
    min_mult = _min_row_multiple(dtype)
    if B <= min_mult or B % min_mult != 0:
        return B  # too small / unaligned to split: single tile (full-dim block)
    # Target ~1024 rows per tile but cap at B // 2 so the grid has >= 2 steps
    # (pipelines the DMA and keeps v7x's second TensorCore busy).
    tile = min(1024, B // 2)
    tile -= tile % min_mult
    tile = max(tile, min_mult)
    while B % tile != 0:  # keep an exact grid (no partial blocks)
        tile -= min_mult
    return tile


def _build_call(B, F, H, tile_b, out_dtype, weight_mode):
    grid = (B // tile_b,)

    def const_spec(shape):
        # Constant operand: same block every grid step.
        if weight_mode is None:
            return pl.BlockSpec(shape, lambda i: (0, 0))
        return pl.BlockSpec(shape, lambda i: (0, 0), pipeline_mode=weight_mode)

    return pl.pallas_call(
        box_encoder_kernel,
        out_shape=jax.ShapeDtypeStruct((B, H), out_dtype),
        grid_spec=pltpu.PrefetchScalarGridSpec(
            num_scalar_prefetch=0,
            grid=grid,
            in_specs=[
                pl.BlockSpec((tile_b, F), lambda i: (i, 0)),  # x batch tile
                const_spec((F, H)),                            # W1 (resident)
                const_spec((1, H)),                            # b1
                const_spec((H, H)),                            # W2 (resident)
                const_spec((1, H)),                            # b2
            ],
            # NOTE: with H=32 the output is lane-sparse (masked stores); that
            # is secondary to the DMA here and we deliberately do NOT pad H to
            # 128 (it would 4x the HBM write traffic in a mem-bound kernel).
            out_specs=pl.BlockSpec((tile_b, H), lambda i: (i, 0)),
        ),
        compiler_params=pltpu.CompilerParams(
            dimension_semantics=("parallel",),
        ),
    )


def box_encoder1(box_input, w1, b1, w2, b2, *, tile_b=None):
    """box_input: (B, F); w1: (F, H); b1: (1, H); w2: (H, H); b2: (1, H)."""
    B, F = box_input.shape
    H = w1.shape[1]

    if tile_b is None:
        tile_b = _pick_tile_b(B, box_input.dtype)
    if tile_b < B:
        min_mult = _min_row_multiple(box_input.dtype)
        assert tile_b % min_mult == 0, (
            f"tile_b={tile_b} must be a multiple of {min_mult} for "
            f"{box_input.dtype} (sublane tiling constraint)")
    assert B % tile_b == 0, f"tile_b={tile_b} must divide B={B}"

    args = (box_input, w1, b1, w2, b2)
    weight_mode = pl.Buffered(1) if hasattr(pl, "Buffered") else None
    try:
        # Single-buffer the constant weights/biases (their index_map never
        # changes), halving their resident VMEM footprint.
        return _build_call(B, F, H, tile_b, box_input.dtype, weight_mode)(*args)
    except Exception:
        if weight_mode is None:
            raise
        # Fallback: default double buffering if Buffered(1) is not supported.
        return _build_call(B, F, H, tile_b, box_input.dtype, None)(*args)


def box_encoder1_ref(box_input, w1, b1, w2, b2):
    """Pure-JAX reference matching the PyTorch forward exactly."""
    h = box_input @ w1 + b1
    h = _leaky_relu(_leaky_relu(h))      # LeakyReLU applied twice, as in torch
    out = h @ w2 + b2
    return _leaky_relu(out)


if __name__ == "__main__":
    # Shapes consistent with the module: feature_size = hidden_size = 32.
    F, H = 32, 32
    key = jax.random.PRNGKey(0)
    kx, kw1, kb1, kw2, kb2 = jax.random.split(key, 5)

    # Deterministic synthetic parameters (Kaiming-ish scale).
    w1 = jax.random.normal(kw1, (F, H), dtype=jnp.float32) * (1.0 / jnp.sqrt(F))
    b1 = jax.random.normal(kb1, (1, H), dtype=jnp.float32) * 0.01
    w2 = jax.random.normal(kw2, (H, H), dtype=jnp.float32) * (1.0 / jnp.sqrt(H))
    b2 = jax.random.normal(kb2, (1, H), dtype=jnp.float32) * 0.01

    # Case 1: batch large enough to tile -> grid of 2 steps (pipelined,
    # shardable across both v7x TensorCores).
    B = 32
    x = jax.random.normal(kx, (B, F), dtype=jnp.float32)
    out = jax.block_until_ready(box_encoder1(x, w1, b1, w2, b2))
    ref = box_encoder1_ref(x, w1, b1, w2, b2)
    assert out.shape == (B, H)
    assert jnp.allclose(out, ref, atol=1e-5, rtol=1e-5)

    # Case 2: tiny batch (typical for this module) -> single full-extent tile.
    Bs = 8
    xs = jax.random.normal(kx, (Bs, F), dtype=jnp.float32)
    outs = jax.block_until_ready(box_encoder1(xs, w1, b1, w2, b2))
    refs = box_encoder1_ref(xs, w1, b1, w2, b2)
    assert outs.shape == (Bs, H)
    assert jnp.allclose(outs, refs, atol=1e-5, rtol=1e-5)

    print("KERNEL_OK")
</pallas_src>

<mosaic_0001>
module attributes {stable_mosaic.version = 11 : i64} {
  func.func @box_encoder_kernel(%arg0: i32, %arg1: memref<16x32xf32, #tpu.memory_space<vmem>>, %arg2: memref<32x32xf32, #tpu.memory_space<vmem>>, %arg3: memref<1x32xf32, #tpu.memory_space<vmem>>, %arg4: memref<32x32xf32, #tpu.memory_space<vmem>>, %arg5: memref<1x32xf32, #tpu.memory_space<vmem>>, %arg6: memref<16x32xf32, #tpu.memory_space<vmem>>) attributes {dimension_semantics = [#tpu.dimension_semantics<parallel>], iteration_bounds = array<i64: 2>, scalar_prefetch = 0 : i64, scratch_operands = 0 : i64, tpu.core_type = #tpu.core_type<tc>, window_params = [{transform_indices = @transform_0, window_bounds = array<i64: 16, 32>}, {pipeline_mode = #tpu.pipeline_mode<synchronous>, transform_indices = @transform_1, window_bounds = array<i64: 32, 32>}, {pipeline_mode = #tpu.pipeline_mode<synchronous>, transform_indices = @transform_2, window_bounds = array<i64: 1, 32>}, {pipeline_mode = #tpu.pipeline_mode<synchronous>, transform_indices = @transform_3, window_bounds = array<i64: 32, 32>}, {pipeline_mode = #tpu.pipeline_mode<synchronous>, transform_indices = @transform_4, window_bounds = array<i64: 1, 32>}, {transform_indices = @transform_5, window_bounds = array<i64: 16, 32>}]} {
    %c0 = arith.constant 0 : index
    %c0_0 = arith.constant 0 : index
    %0 = vector.load %arg1[%c0, %c0_0] : memref<16x32xf32, #tpu.memory_space<vmem>>, vector<16x32xf32>
    %c0_1 = arith.constant 0 : index
    %c0_2 = arith.constant 0 : index
    %1 = vector.load %arg2[%c0_1, %c0_2] : memref<32x32xf32, #tpu.memory_space<vmem>>, vector<32x32xf32>
    %cst = arith.constant dense<0.000000e+00> : vector<16x32xf32>
    %2 = tpu.matmul %0, %1, %cst {dimension_numbers = #tpu.dot_dimension_numbers<[1], [0], [0], [1], [0, 0, 1, 1], [], []>} : vector<16x32xf32>, vector<32x32xf32>, vector<16x32xf32> -> vector<16x32xf32>
    %c0_3 = arith.constant 0 : index
    %c0_4 = arith.constant 0 : index
    %3 = vector.load %arg3[%c0_3, %c0_4] : memref<1x32xf32, #tpu.memory_space<vmem>>, vector<1x32xf32>
    %4 = vector.broadcast %3 : vector<1x32xf32> to vector<16x32xf32>
    %5 = arith.addf %2, %4 : vector<16x32xf32>
    %cst_5 = arith.constant 0.000000e+00 : f32
    %6 = vector.broadcast %cst_5 : f32 to vector<16x32xf32>
    %7 = arith.cmpf ogt, %5, %6 : vector<16x32xf32>
    %cst_6 = arith.constant 0.00999999977 : f32
    %8 = vector.broadcast %cst_6 : f32 to vector<16x32xf32>
    %9 = arith.mulf %8, %5 : vector<16x32xf32>
    %10 = arith.select %7, %5, %9 : vector<16x32xi1>, vector<16x32xf32>
    %c0_7 = arith.constant 0 : index
    %c0_8 = arith.constant 0 : index
    %11 = vector.load %arg4[%c0_7, %c0_8] : memref<32x32xf32, #tpu.memory_space<vmem>>, vector<32x32xf32>
    %cst_9 = arith.constant dense<0.000000e+00> : vector<16x32xf32>
    %12 = tpu.matmul %10, %11, %cst_9 {dimension_numbers = #tpu.dot_dimension_numbers<[1], [0], [0], [1], [0, 0, 1, 1], [], []>} : vector<16x32xf32>, vector<32x32xf32>, vector<16x32xf32> -> vector<16x32xf32>
    %c0_10 = arith.constant 0 : index
    %c0_11 = arith.constant 0 : index
    %13 = vector.load %arg5[%c0_10, %c0_11] : memref<1x32xf32, #tpu.memory_space<vmem>>, vector<1x32xf32>
    %14 = vector.broadcast %13 : vector<1x32xf32> to vector<16x32xf32>
    %15 = arith.addf %12, %14 : vector<16x32xf32>
    %cst_12 = arith.constant 0.000000e+00 : f32
    %16 = vector.broadcast %cst_12 : f32 to vector<16x32xf32>
    %17 = arith.cmpf ogt, %15, %16 : vector<16x32xf32>
    %cst_13 = arith.constant 1.000000e-01 : f32
    %18 = vector.broadcast %cst_13 : f32 to vector<16x32xf32>
    %19 = arith.mulf %18, %15 : vector<16x32xf32>
    %20 = arith.select %17, %15, %19 : vector<16x32xi1>, vector<16x32xf32>
    %c0_14 = arith.constant 0 : index
    %c0_15 = arith.constant 0 : index
    %21 = vector.load %arg6[%c0_14, %c0_15] : memref<16x32xf32, #tpu.memory_space<vmem>>, vector<16x32xf32>
    tpu.vector_store %arg6[%c0_14, %c0_15], %20 {strides = array<i32>} : memref<16x32xf32, #tpu.memory_space<vmem>>, vector<16x32xf32>,
    return
  }
  func.func @transform_0(%arg0: i32) -> (i32, i32) {
    %c0_i32 = arith.constant 0 : i32
    %c0_i32_0 = arith.constant 0 : i32
    return %arg0, %c0_i32 : i32, i32
  }
  func.func @transform_1(%arg0: i32) -> (i32, i32) {
    %c0_i32 = arith.constant 0 : i32
    %c0_i32_0 = arith.constant 0 : i32
    %c0_i32_1 = arith.constant 0 : i32
    return %c0_i32, %c0_i32_0 : i32, i32
  }
  func.func @transform_2(%arg0: i32) -> (i32, i32) {
    %c0_i32 = arith.constant 0 : i32
    %c0_i32_0 = arith.constant 0 : i32
    %c0_i32_1 = arith.constant 0 : i32
    return %c0_i32, %c0_i32_0 : i32, i32
  }
  func.func @transform_3(%arg0: i32) -> (i32, i32) {
    %c0_i32 = arith.constant 0 : i32
    %c0_i32_0 = arith.constant 0 : i32
    %c0_i32_1 = arith.constant 0 : i32
    return %c0_i32, %c0_i32_0 : i32, i32
  }
  func.func @transform_4(%arg0: i32) -> (i32, i32) {
    %c0_i32 = arith.constant 0 : i32
    %c0_i32_0 = arith.constant 0 : i32
    %c0_i32_1 = arith.constant 0 : i32
    return %c0_i32, %c0_i32_0 : i32, i32
  }
  func.func @transform_5(%arg0: i32) -> (i32, i32) {
    %c0_i32 = arith.constant 0 : i32
    %c0_i32_0 = arith.constant 0 : i32
    return %arg0, %c0_i32 : i32, i32
  }
}

module attributes {stable_mosaic.version = 11 : i64} {
  func.func @box_encoder_kernel(%arg0: i32, %arg1: memref<16x32xf32, #tpu.memory_space<vmem>>, %arg2: memref<32x32xf32, #tpu.memory_space<vmem>>, %arg3: memref<1x32xf32, #tpu.memory_space<vmem>>, %arg4: memref<32x32xf32, #tpu.memory_space<vmem>>, %arg5: memref<1x32xf32, #tpu.memory_space<vmem>>, %arg6: memref<16x32xf32, #tpu.memory_space<vmem>>) attributes {dimension_semantics = [#tpu.dimension_semantics<parallel>], iteration_bounds = array<i64: 2>, scalar_prefetch = 0 : i64, scratch_operands = 0 : i64, tpu.core_type = #tpu.core_type<tc>, window_params = [{transform_indices = @transform_0, window_bounds = array<i64: 16, 32>}, {pipeline_mode = #tpu.pipeline_mode<synchronous>, transform_indices = @transform_1, window_bounds = array<i64: 32, 32>}, {pipeline_mode = #tpu.pipeline_mode<synchronous>, transform_indices = @transform_2, window_bounds = array<i64: 1, 32>}, {pipeline_mode = #tpu.pipeline_mode<synchronous>, transform_indices = @transform_3, window_bounds = array<i64: 32, 32>}, {pipeline_mode = #tpu.pipeline_mode<synchronous>, transform_indices = @transform_4, window_bounds = array<i64: 1, 32>}, {transform_indices = @transform_5, window_bounds = array<i64: 16, 32>}]} {
    %c0 = arith.constant 0 : index
    %c0_0 = arith.constant 0 : index
    %0 = vector.load %arg1[%c0, %c0_0] : memref<16x32xf32, #tpu.memory_space<vmem>>, vector<16x32xf32>
    %c0_1 = arith.constant 0 : index
    %c0_2 = arith.constant 0 : index
    %1 = vector.load %arg2[%c0_1, %c0_2] : memref<32x32xf32, #tpu.memory_space<vmem>>, vector<32x32xf32>
    %cst = arith.constant dense<0.000000e+00> : vector<16x32xf32>
    %2 = tpu.matmul %0, %1, %cst {dimension_numbers = #tpu.dot_dimension_numbers<[1], [0], [0], [1], [0, 0, 1, 1], [], []>} : vector<16x32xf32>, vector<32x32xf32>, vector<16x32xf32> -> vector<16x32xf32>
    %c0_3 = arith.constant 0 : index
    %c0_4 = arith.constant 0 : index
    %3 = vector.load %arg3[%c0_3, %c0_4] : memref<1x32xf32, #tpu.memory_space<vmem>>, vector<1x32xf32>
    %4 = vector.broadcast %3 : vector<1x32xf32> to vector<16x32xf32>
    %5 = arith.addf %2, %4 : vector<16x32xf32>
    %cst_5 = arith.constant 0.000000e+00 : f32
    %6 = vector.broadcast %cst_5 : f32 to vector<16x32xf32>
    %7 = arith.cmpf ogt, %5, %6 : vector<16x32xf32>
    %cst_6 = arith.constant 0.00999999977 : f32
    %8 = vector.broadcast %cst_6 : f32 to vector<16x32xf32>
    %9 = arith.mulf %8, %5 : vector<16x32xf32>
    %10 = arith.select %7, %5, %9 : vector<16x32xi1>, vector<16x32xf32>
    %c0_7 = arith.constant 0 : index
    %c0_8 = arith.constant 0 : index
    %11 = vector.load %arg4[%c0_7, %c0_8] : memref<32x32xf32, #tpu.memory_space<vmem>>, vector<32x32xf32>
    %cst_9 = arith.constant dense<0.000000e+00> : vector<16x32xf32>
    %12 = tpu.matmul %10, %11, %cst_9 {dimension_numbers = #tpu.dot_dimension_numbers<[1], [0], [0], [1], [0, 0, 1, 1], [], []>} : vector<16x32xf32>, vector<32x32xf32>, vector<16x32xf32> -> vector<16x32xf32>
    %c0_10 = arith.constant 0 : index
    %c0_11 = arith.constant 0 : index
    %13 = vector.load %arg5[%c0_10, %c0_11] : memref<1x32xf32, #tpu.memory_space<vmem>>, vector<1x32xf32>
    %14 = vector.broadcast %13 : vector<1x32xf32> to vector<16x32xf32>
    %15 = arith.addf %12, %14 : vector<16x32xf32>
    %cst_12 = arith.constant 0.000000e+00 : f32
    %16 = vector.broadcast %cst_12 : f32 to vector<16x32xf32>
    %17 = arith.cmpf ogt, %15, %16 : vector<16x32xf32>
    %cst_13 = arith.constant 1.000000e-01 : f32
    %18 = vector.broadcast %cst_13 : f32 to vector<16x32xf32>
    %19 = arith.mulf %18, %15 : vector<16x32xf32>
    %20 = arith.select %17, %15, %19 : vector<16x32xi1>, vector<16x32xf32>
    %c0_14 = arith.constant 0 : index
    %c0_15 = arith.constant 0 : index
    %21 = vector.load %arg6[%c0_14, %c0_15] : memref<16x32xf32, #tpu.memory_space<vmem>>, vector<16x32xf32>
    tpu.vector_store %arg6[%c0_14, %c0_15], %20 {strides = array<i32>} : memref<16x32xf32, #tpu.memory_space<vmem>>, vector<16x32xf32>,
    return
  }
  func.func @transform_0(%arg0: i32) -> (i32, i32) {
    %c0_i32 = arith.constant 0 : i32
    %c0_i32_0 = arith.constant 0 : i32
    return %arg0, %c0_i32 : i32, i32
  }
  func.func @transform_1(%arg0: i32) -> (i32, i32) {
    %c0_i32 = arith.constant 0 : i32
    %c0_i32_0 = arith.constant 0 : i32
    %c0_i32_1 = arith.constant 0 : i32
    return %c0_i32, %c0_i32_0 : i32, i32
  }
  func.func @transform_2(%arg0: i32) -> (i32, i32) {
    %c0_i32 = arith.constant 0 : i32
    %c0_i32_0 = arith.constant 0 : i32
    %c0_i32_1 = arith.constant 0 : i32
    return %c0_i32, %c0_i32_0 : i32, i32
  }
  func.func @transform_3(%arg0: i32) -> (i32, i32) {
    %c0_i32 = arith.constant 0 : i32
    %c0_i32_0 = arith.constant 0 : i32
    %c0_i32_1 = arith.constant 0 : i32
    return %c0_i32, %c0_i32_0 : i32, i32
  }
  func.func @transform_4(%arg0: i32) -> (i32, i32) {
    %c0_i32 = arith.constant 0 : i32
    %c0_i32_0 = arith.constant 0 : i32
    %c0_i32_1 = arith.constant 0 : i32
    return %c0_i32, %c0_i32_0 : i32, i32
  }
  func.func @transform_5(%arg0: i32) -> (i32, i32) {
    %c0_i32 = arith.constant 0 : i32
    %c0_i32_0 = arith.constant 0 : i32
    return %arg0, %c0_i32 : i32, i32
  }
}

</mosaic_0001>

<bundles_post_ra>
// kernel: tpu_custom_call.1
= control target key start
LH: loop header
LB: loop body
LE: loop exit
PB: predicated region body
PF: predicated region fallthrough
CT: control target
= control target key end

     0   :  { %10 = vsyncpa [#allocation3], 0  ;;  %s948_s0 = inlined_call_operand.hbm [shape: f32[32,32], index: 0, kind: input, shape index: {}]   ;;  %s949_s1 = inlined_call_operand.hbm [shape: f32[32,32], index: 1, kind: input, shape index: {}]   ;;  %s950_s2 = inlined_call_operand.vmem [shape: f32[1,32], index: 2, kind: input, shape index: {}]   ;;  %s951_s3 = inlined_call_operand.hbm [shape: f32[32,32], index: 3, kind: input, shape index: {}]   ;;  %s952_s4 = inlined_call_operand.vmem [shape: f32[1,32], index: 4, kind: input, shape index: {}]   ;;  %s953_s5 = inlined_call_operand.hbm [shape: f32[32,32], index: 5, kind: output, shape index: {}]  }
   0x1   :  { %12 = vsyncpa [#allocation3 + $0x1], 0 }
   0x2   :  { %13 = vsyncpa [#allocation6], 0 }
   0x3   :  { %14 = vsyncpa [#allocation4], 0 }
   0x4   :  { %16 = vsyncpa [#allocation4 + $0x1], 0  ;;  %s782_s18 = smov 0   ;;  %s784_s19 = smov 0  }
   0x5   :  { %s786_s20 = smov 0   ;;  %s788_s21 = smov 0  }
   0x6 LB: > { %s803_s22 = sadd.s32 4294967295, %s744_s21   ;;  %s479_s23 = sadd.s32 4294967294, %s744_s21   ;;  %s744_s21 = sphi %s788_s21, %s965_s21   ;;  %s740_s20 = sphi %s786_s20, %s964_s20   ;;  %s736_s19 = sphi %s784_s19, %s963_s19   ;;  %s732_s18 = sphi %s782_s18, %s962_s18  }
   0x7   : > { %p42_p0 = scmp.ne.s32.totalorder %s736_s19, %s732_s18  ;;  %p43_p1 = scmp.eq.s32.totalorder %s803_s22, 0 }
   0x8   : > { %p150_p2 = scmp.eq.s32.totalorder %s803_s22, 1  ;;  %p156_p3 = scmp.eq.s32.totalorder %s479_s23, 1 }
   0x9   : > { %p812_p4 = por %p43_p1, %p42_p0  ;;  %p480_p5 = scmp.ge.s32.totalorder %s744_s21, 1 }
   0xa   : > { %p817_p6 = por %p156_p3, %p42_p0  ;;  %p163_p7 = scmp.lt.s32.totalorder %s744_s21, 3 }
   0xb   : > { %s174_s28 = sshll.u32 %s949_s1, 4  ;;  %s746_s30 = smov [#allocation5]   ;;  %s175_s28 = int_to_ptr.hbm [resolvable:$true] %s174_s28 }
   0xc   : > { %p825_p8 = pnand %p480_p5, %p163_p7  ;;  %s176_s6 = sshll.u32 %s746_s30, 4  ;;  %s177_s6 = int_to_ptr.vmem [resolvable:$true] %s176_s6 }
   0xd   : > { %s191_s9 = sshll.u32 %s951_s3, 4  ;;  %s954_s10 = smov 128   ;;  %s192_s9 = int_to_ptr.hbm [resolvable:$true] %s191_s9 }
   0xe   : > { %p523_p9 = pneg %p825_p8  ;;  %s748_s11 = smov 8  }
   0xf   : > { %s749_s12 = smov [#allocation7]   ;;  %s844_s14 = sadd.s32 1, %s744_s21  }
  0x10   : > { %p524_p10 = pnand %p523_p9, %p43_p1  ;;  %s193_s13 = sshll.u32 %s749_s12, 4  ;;  %s194_s13 = int_to_ptr.vmem [resolvable:$true] %s193_s13 }
  0x11   : > { %s29_s15 = sadd.s32 1, %s740_s20  ;;  %s26_s16 = ssub.s32 %s744_s21, %s844_s14 }
  0x12   : > { %526 = dma.hbm_to_vmem [thread:$0]  (!%p524_p10), %s175_s28, 512, %s177_s6, [#allocation6], %s954_s10, %s954_s10, %s748_s11  }
  0x13   : > { %529 = dma.hbm_to_vmem [thread:$0]  (!%p524_p10), %s192_s9, 512, %s194_s13, [#allocation6], %s954_s10, %s954_s10, %s748_s11  }
  0x14   : > { %p36_p12 = scmp.ne.s32.totalorder %s740_s20, %s736_s19  ;;  %p27_p13 = scmp.eq.s32.totalorder %s26_s16, 0 }
  0x15   : > { %p37_p0 = scmp.eq.s32.totalorder %s744_s21, 0  ;;  %p540_p5 = scmp.lt.s32.totalorder %s744_s21, 2 }
  0x16   : > { %p854_p3 = por %p150_p2, %p36_p12  ;;  %s210_s26 = sand.u32 1, %s740_s20  }
  0x17   : > { %s860_s23 = scalar_select %p27_p13, %s740_s20, %s29_s15  }
  0x18   : > { %p38_p7 = por %p37_p0, %p36_p12  ;;  %s484_s27 = sshll.u32 %s210_s26, 4 }
  0x19   : > { %s501_s28 = sshll.u32 %s744_s21, 4  ;;  %s214_s8 = scalar_lea.vmem [#allocation2], %s484_s27 }
  0x1a   : > { %s219_s7 = scalar_lea.hbm %s948_s0, %s501_s28  ;;  %s222_s9 = sshll.u32 %s214_s8, 4  ;;  %s223_s9 = int_to_ptr.vmem [resolvable:$true] %s222_s9 }
  0x1b   : > { %s220_s12 = sshll.u32 %s219_s7, 4  ;;  %p867_p2 = pnand %p540_p5, %p38_p7  ;;  %s221_s12 = int_to_ptr.hbm [resolvable:$true] %s220_s12 }
  0x1c   : > { %s211_s15 = scalar_lea.sflag [#allocation3], %s210_s26  ;;  %s644_s16 = sshra.s32 %s221_s12, 4  ;;  %s645_s16 = int_to_ptr.hbm [resolvable:$true] %s644_s16 }
  0x1d   : > { %s646_s10 = scalar_lea.hbm %s645_s16, 16  ;;  %p648_p10 = pneg %p867_p2 }
  0x1e   : > { %p647_p9 = scmp.ne.s32.totalorder %s645_s16, %s646_s10  ;;  %s651_s30 = scalar_lea.hbm %s948_s0, 32 }
  0x1f   : > { %p652_p0 = scmp.lt.s32.totalorder %s645_s16, %s948_s0  ;;  %p653_p5 = scmp.lt.s32.totalorder %s651_s30, %s646_s10 }
  0x20   : > { %p649_p12 = pnand %p648_p10, %p647_p9 }
  0x21   : > { %p654_p7 = por %p653_p5, %p652_p0 }
  0x22   : > { %p650_p13 = pneg %p649_p12 }
  0x24   : > { %p655_p11 = pnand %p654_p7, %p650_p13 }
  0x26   : > { %658 = shalt.err (!%p655_p11)
}
  0x27   : > { %s960_s26 = smov 128   ;;  %234 = sbr.rel (%p825_p8) target bundleno = 333 (0x14d), region = 40 }
  0x28   : > { %533 = dma.hbm_to_vmem [thread:$0]  (!%p867_p2), %s221_s12, 256, %s223_s9, %s211_s15, %s960_s26, %s960_s26, %s748_s11  }
  0x29   : > { %s887_s8 = sand.u32 (!%p825_p8), 1, %s736_s19  }
  0x2a   : > { %s488_s10 = sshll.u32 (!%p825_p8), %s887_s8, 4  ;;  %s237_s16 = scalar_lea.sflag (!%p825_p8), [#allocation3], %s887_s8 }
  0x2b   : > { %s240_s28 = scalar_lea.vmem (!%p825_p8), [#allocation2], %s488_s10 }
  0x2c   : > { %719 = dma.done.wait (%p812_p4), %s237_s16, 256  }
  0x2d   : > { %721 = vsyncadd (%p812_p4), %s237_s16, 4294967040 }
  0x2e   : > { %723 = dma.done.wait (%p43_p1), [#allocation6], 1024  }
  0x2f   : > { %725 = vsyncadd (%p43_p1), [#allocation6], 4294966272  ;;  %v285_v0 = vld [vmem:[#allocation5 + $0x18] sm:$0xff]  ;;  %v284_v1 = vld [vmem:[#allocation5 + $0x10] sm:$0xff]  ;;  %vm290_vm0 = vcmask 261120   ;;  %s277_s12 = scalar_lea.vmem [#allocation8], %s488_s10 }
  0x30   : > { %503 = vmatpush.msra.mxu2 %v285_v0  ;;  %309 = vmatpush.msra.mxu0 %v285_v0  ;;  %v283_v2 = vld [vmem:[#allocation5 + $0x8] sm:$0xff]  ;;  %v329_v3 = vld [vmem:[#allocation7 + $0x18] sm:$0xff]  ;;  %v282_v4 = vld [vmem:[#allocation5] sm:$0xff]  ;;  %s502_s13 = sshll.u32 %s803_s22, 4  ;;  %s384_s6 = sshll.u32 %s277_s12, 4  ;;  %s385_s6 = int_to_ptr.vmem [resolvable:$true] %s384_s6 }
  0x31   : > { %507 = vmatpush.msra.mxu3 %v329_v3  ;;  %352 = vmatpush.msra.mxu1 %v329_v3  ;;  %v281_v5 = vld [vmem:[%s240_s28 + $0x8] sm:$0xff]  ;;  %v280_v6 = vld [vmem:[%s240_s28] sm:$0xff]  ;;  %s383_s30 = scalar_lea.hbm %s953_s5, %s502_s13  ;;  %s372_s26 = scalar_lea.sflag [#allocation4], %s887_s8 }
  0x32   : > { %504 = vmatpush.msra.mxu2 %v284_v1  ;;  %310 = vmatpush.msra.mxu0 %v284_v1  ;;  %v328_v7 = vld [vmem:[#allocation7 + $0x10] sm:$0xff]  ;;  %v327_v8 = vld [vmem:[#allocation7 + $0x8] sm:$0xff]  ;;  %v326_v9 = vld [vmem:[#allocation7] sm:$0xff]  ;;  %s386_s7 = sshll.u32 %s383_s30, 4  ;;  %s694_s24 = scalar_lea.hbm %s953_s5, 32  ;;  %s387_s7 = int_to_ptr.hbm [resolvable:$true] %s386_s7 }
  0x33   : > { %508 = vmatpush.msra.mxu3 %v328_v7  ;;  %353 = vmatpush.msra.mxu1 %v328_v7  ;;  %v582_v10 = vld [vmem:[%s950_s2] ss:$0 sm:$0xff]  ;;  %s688_s10 = sshra.s32 %s387_s7, 4  ;;  %s689_s10 = int_to_ptr.hbm [resolvable:$true] %s688_s10 }
  0x34   : > { %505 = vmatpush.msra.mxu2 %v283_v2  ;;  %311 = vmatpush.msra.mxu0 %v283_v2  ;;  %v583_v19 = vld [vmem:[%s952_s4] ss:$0 sm:$0xff]  ;;  %s690_s22 = scalar_lea.hbm %s689_s10, 16  ;;  %p695_p11 = scmp.lt.s32.totalorder %s689_s10, %s953_s5 }
  0x35   : > { %509 = vmatpush.msra.mxu3 %v327_v8  ;;  %354 = vmatpush.msra.mxu1 %v327_v8  ;;  %p691_p1 = scmp.ne.s32.totalorder %s689_s10, %s690_s22  ;;  %p696_p2 = scmp.lt.s32.totalorder %s694_s24, %s690_s22 }
  0x36   : > { %506 = vmatpush.msra.mxu2 %v282_v4  ;;  %312 = vmatpush.msra.mxu0 %v282_v4 }
  0x37   : > { %493 = vmatmul.msk.f32.vlgmr.msra.gmra.mxu2 %vm290_vm0, %v281_v5  ;;  %492 = vmatmul.msk.f32.vlgmr.msra.gmra.mxu0 %vm290_vm0, %v280_v6  ;;  %p692_p4 = pnand %p691_p1, %p854_p3  ;;  %p697_p9 = por %p696_p2, %p695_p11 }
  0x38   : > { %510 = vmatpush.msra.mxu3 %v326_v9  ;;  %355 = vmatpush.msra.mxu1 %v326_v9 }
  0x39   : > { %p693_p8 = pneg %p692_p4 }
  0x3b   : > { %p698_p10 = pnand %p697_p9, %p693_p8 }
  0xb4   : > { %v314_v11 = vpop.f32.mrf.mxu0 }
  0xb5   : > { %v315_v12 = vadd.f32 %v582_v10, %v314_v11 }
  0xb7   : > { %v322_v13 = vmul.f32 0.01, %v315_v12  ;;  %vm320_vm1 = vcmp.gt.f32.partialorder %v315_v12, 0.0 }
  0xb9   : > { %v324_v14 = vsel %vm320_vm1, %v315_v12, %v322_v13 }
  0xba   : > { %v317_v15 = vpop.f32.mrf.mxu2  ;;  %494 = vmatmul.msk.f32.vlgmr.msra.gmra.mxu1 %vm290_vm0, %v324_v14 }
  0xbb   : > { %v318_v16 = vadd.f32 %v582_v10, %v317_v15 }
  0xbd   : > { %v323_v17 = vmul.f32 0.01, %v318_v16  ;;  %vm321_vm2 = vcmp.gt.f32.partialorder %v318_v16, 0.0 }
  0xbf   : > { %v325_v18 = vsel %vm321_vm2, %v318_v16, %v323_v17 }
  0xc0   : > { %495 = vmatmul.msk.f32.vlgmr.msra.gmra.mxu3 %vm290_vm0, %v325_v18 }
 0x137   : > { %v357_v20 = vpop.f32.mrf.mxu1 }
 0x138   : > { %v358_v21 = vadd.f32 %v583_v19, %v357_v20 }
 0x13a   : > { %vm363_vm3 = vcmp.gt.f32.partialorder %v358_v21, 0.0  ;;  %v365_v22 = vmul.f32 0.1, %v358_v21 }
 0x13c   : > { %v367_v23 = vsel %vm363_vm3, %v358_v21, %v365_v22 }
 0x13d   : > { %369 = vst.msk [vmem:[%s277_s12] sm:$0xff] %vm290_vm0, %v367_v23 }
 0x143   : > { %v360_v24 = vpop.f32.mrf.mxu3 }
 0x144   : > { %v361_v25 = vadd.f32 %v583_v19, %v360_v24 }
 0x146   : > { %vm364_vm4 = vcmp.gt.f32.partialorder %v361_v25, 0.0  ;;  %v366_v26 = vmul.f32 0.1, %v361_v25 }
 0x148   : > { %v368_v27 = vsel %vm364_vm4, %v361_v25, %v366_v26 }
 0x149   : > { %370 = vst.msk [vmem:[%s277_s12 + $0x8] sm:$0xff] %vm290_vm0, %v368_v27 }
 0x14a   : > { %701 = shalt.err (!%p698_p10)
}
 0x14b   : > { %s750_s8 = smov 128   ;;  %s751_s9 = smov 8  }
 0x14c   : > { %521 = dma.vmem_to_hbm [thread:$0]  (%p854_p3), %s385_s6, 256, %s387_s7, %s372_s26, %s750_s8, %s750_s8, %s751_s9  }
 0x14d PF: > { %s401_s12 = sand.u32 1, %s732_s18   ;;  %p961_p12 = scmp.ge.s32.totalorder %s744_s21, 2 }
 0x14e   : > { %s402_s13 = scalar_lea.sflag [#allocation4], %s401_s12 }
 0x14f   : > { %p535_p13 = pnand %p961_p12, %p817_p6 }
 0x151   : > { %p536_p0 = pneg %p535_p13 }
 0x153   : > { %727 = dma.done.wait (%p536_p0), %s402_s13, 256  }
 0x154   : > { %729 = vsyncadd (%p536_p0), %s402_s13, 4294967040  ;;  %p19_p5 = scmp.ge.s32.totalorder %s844_s14, 4   ;;  %s962_s18 = smov %s736_s19 }
 0x155   : > { %s963_s19 = smov %s740_s20  ;;  %s964_s20 = smov %s860_s23 }
 0x156   : > { %s965_s21 = smov %s844_s14  ;;  %21 = sbr.rel (!%p19_p5) target bundleno = 6 (0x6), region = 93 }
 0x15b   :  { %408 = vsyncpa [#allocation3], 1 }
 0x15c   :  { %410 = vsyncpa [#allocation3 + $0x1], 1 }
 0x15d   :  { %411 = vsyncpa [#allocation6], 1 }
 0x15e   :  { %412 = vsyncpa [#allocation4], 1 }
 0x15f   :  { %414 = vsyncpa [#allocation4 + $0x1], 1 }

// kernel: tpu_custom_call.1
= control target key start
LH: loop header
LB: loop body
LE: loop exit
PB: predicated region body
PF: predicated region fallthrough
CT: control target
= control target key end

     0   :  { %10 = vsyncpa [#allocation3], 0  ;;  %s948_s0 = inlined_call_operand.hbm [shape: f32[32,32], index: 0, kind: input, shape index: {}]   ;;  %s949_s1 = inlined_call_operand.hbm [shape: f32[32,32], index: 1, kind: input, shape index: {}]   ;;  %s950_s2 = inlined_call_operand.vmem [shape: f32[1,32], index: 2, kind: input, shape index: {}]   ;;  %s951_s3 = inlined_call_operand.hbm [shape: f32[32,32], index: 3, kind: input, shape index: {}]   ;;  %s952_s4 = inlined_call_operand.vmem [shape: f32[1,32], index: 4, kind: input, shape index: {}]   ;;  %s953_s5 = inlined_call_operand.hbm [shape: f32[32,32], index: 5, kind: output, shape index: {}]  }
   0x1   :  { %12 = vsyncpa [#allocation3 + $0x1], 0 }
   0x2   :  { %13 = vsyncpa [#allocation6], 0 }
   0x3   :  { %14 = vsyncpa [#allocation4], 0 }
   0x4   :  { %16 = vsyncpa [#allocation4 + $0x1], 0  ;;  %s782_s18 = smov 0   ;;  %s784_s19 = smov 0  }
   0x5   :  { %s786_s20 = smov 0   ;;  %s788_s21 = smov 0  }
   0x6 LB: > { %s803_s22 = sadd.s32 4294967295, %s744_s21   ;;  %s479_s23 = sadd.s32 4294967294, %s744_s21   ;;  %s744_s21 = sphi %s788_s21, %s965_s21   ;;  %s740_s20 = sphi %s786_s20, %s964_s20   ;;  %s736_s19 = sphi %s784_s19, %s963_s19   ;;  %s732_s18 = sphi %s782_s18, %s962_s18  }
   0x7   : > { %p42_p0 = scmp.ne.s32.totalorder %s736_s19, %s732_s18  ;;  %p43_p1 = scmp.eq.s32.totalorder %s803_s22, 0 }
   0x8   : > { %p150_p2 = scmp.eq.s32.totalorder %s803_s22, 1  ;;  %p156_p3 = scmp.eq.s32.totalorder %s479_s23, 1 }
   0x9   : > { %p812_p4 = por %p43_p1, %p42_p0  ;;  %p480_p5 = scmp.ge.s32.totalorder %s744_s21, 1 }
   0xa   : > { %p817_p6 = por %p156_p3, %p42_p0  ;;  %p163_p7 = scmp.lt.s32.totalorder %s744_s21, 3 }
   0xb   : > { %s174_s28 = sshll.u32 %s949_s1, 4  ;;  %s746_s30 = smov [#allocation5]   ;;  %s175_s28 = int_to_ptr.hbm [resolvable:$true] %s174_s28 }
   0xc   : > { %p825_p8 = pnand %p480_p5, %p163_p7  ;;  %s176_s6 = sshll.u32 %s746_s30, 4  ;;  %s177_s6 = int_to_ptr.vmem [resolvable:$true] %s176_s6 }
   0xd   : > { %s191_s9 = sshll.u32 %s951_s3, 4  ;;  %s954_s10 = smov 128   ;;  %s192_s9 = int_to_ptr.hbm [resolvable:$true] %s191_s9 }
   0xe   : > { %p523_p9 = pneg %p825_p8  ;;  %s748_s11 = smov 8  }
   0xf   : > { %s749_s12 = smov [#allocation7]   ;;  %s844_s14 = sadd.s32 1, %s744_s21  }
  0x10   : > { %p524_p10 = pnand %p523_p9, %p43_p1  ;;  %s193_s13 = sshll.u32 %s749_s12, 4  ;;  %s194_s13 = int_to_ptr.vmem [resolvable:$true] %s193_s13 }
  0x11   : > { %s29_s15 = sadd.s32 1, %s740_s20  ;;  %s26_s16 = ssub.s32 %s744_s21, %s844_s14 }
  0x12   : > { %526 = dma.hbm_to_vmem [thread:$0]  (!%p524_p10), %s175_s28, 512, %s177_s6, [#allocation6], %s954_s10, %s954_s10, %s748_s11  }
  0x13   : > { %529 = dma.hbm_to_vmem [thread:$0]  (!%p524_p10), %s192_s9, 512, %s194_s13, [#allocation6], %s954_s10, %s954_s10, %s748_s11  }
  0x14   : > { %p36_p12 = scmp.ne.s32.totalorder %s740_s20, %s736_s19  ;;  %p27_p13 = scmp.eq.s32.totalorder %s26_s16, 0 }
  0x15   : > { %p37_p0 = scmp.eq.s32.totalorder %s744_s21, 0  ;;  %p540_p5 = scmp.lt.s32.totalorder %s744_s21, 2 }
  0x16   : > { %p854_p3 = por %p150_p2, %p36_p12  ;;  %s210_s26 = sand.u32 1, %s740_s20  }
  0x17   : > { %s860_s23 = scalar_select %p27_p13, %s740_s20, %s29_s15  }
  0x18   : > { %p38_p7 = por %p37_p0, %p36_p12  ;;  %s484_s27 = sshll.u32 %s210_s26, 4 }
  0x19   : > { %s501_s28 = sshll.u32 %s744_s21, 4  ;;  %s214_s8 = scalar_lea.vmem [#allocation2], %s484_s27 }
  0x1a   : > { %s219_s7 = scalar_lea.hbm %s948_s0, %s501_s28  ;;  %s222_s9 = sshll.u32 %s214_s8, 4  ;;  %s223_s9 = int_to_ptr.vmem [resolvable:$true] %s222_s9 }
  0x1b   : > { %s220_s12 = sshll.u32 %s219_s7, 4  ;;  %p867_p2 = pnand %p540_p5, %p38_p7  ;;  %s221_s12 = int_to_ptr.hbm [resolvable:$true] %s220_s12 }
  0x1c   : > { %s211_s15 = scalar_lea.sflag [#allocation3], %s210_s26  ;;  %s644_s16 = sshra.s32 %s221_s12, 4  ;;  %s645_s16 = int_to_ptr.hbm [resolvable:$true] %s644_s16 }
  0x1d   : > { %s646_s10 = scalar_lea.hbm %s645_s16, 16  ;;  %p648_p10 = pneg %p867_p2 }
  0x1e   : > { %p647_p9 = scmp.ne.s32.totalorder %s645_s16, %s646_s10  ;;  %s651_s30 = scalar_lea.hbm %s948_s0, 32 }
  0x1f   : > { %p652_p0 = scmp.lt.s32.totalorder %s645_s16, %s948_s0  ;;  %p653_p5 = scmp.lt.s32.totalorder %s651_s30, %s646_s10 }
  0x20   : > { %p649_p12 = pnand %p648_p10, %p647_p9 }
  0x21   : > { %p654_p7 = por %p653_p5, %p652_p0 }
  0x22   : > { %p650_p13 = pneg %p649_p12 }
  0x24   : > { %p655_p11 = pnand %p654_p7, %p650_p13 }
  0x26   : > { %658 = shalt.err (!%p655_p11)
}
  0x27   : > { %s960_s26 = smov 128   ;;  %234 = sbr.rel (%p825_p8) target bundleno = 333 (0x14d), region = 40 }
  0x28   : > { %533 = dma.hbm_to_vmem [thread:$0]  (!%p867_p2), %s221_s12, 256, %s223_s9, %s211_s15, %s960_s26, %s960_s26, %s748_s11  }
  0x29   : > { %s887_s8 = sand.u32 (!%p825_p8), 1, %s736_s19  }
  0x2a   : > { %s488_s10 = sshll.u32 (!%p825_p8), %s887_s8, 4  ;;  %s237_s16 = scalar_lea.sflag (!%p825_p8), [#allocation3], %s887_s8 }
  0x2b   : > { %s240_s28 = scalar_lea.vmem (!%p825_p8), [#allocation2], %s488_s10 }
  0x2c   : > { %719 = dma.done.wait (%p812_p4), %s237_s16, 256  }
  0x2d   : > { %721 = vsyncadd (%p812_p4), %s237_s16, 4294967040 }
  0x2e   : > { %723 = dma.done.wait (%p43_p1), [#allocation6], 1024  }
  0x2f   : > { %725 = vsyncadd (%p43_p1), [#allocation6], 4294966272  ;;  %v285_v0 = vld [vmem:[#allocation5 + $0x18] sm:$0xff]  ;;  %v284_v1 = vld [vmem:[#allocation5 + $0x10] sm:$0xff]  ;;  %vm290_vm0 = vcmask 261120   ;;  %s277_s12 = scalar_lea.vmem [#allocation8], %s488_s10 }
  0x30   : > { %503 = vmatpush.msra.mxu2 %v285_v0  ;;  %309 = vmatpush.msra.mxu0 %v285_v0  ;;  %v283_v2 = vld [vmem:[#allocation5 + $0x8] sm:$0xff]  ;;  %v329_v3 = vld [vmem:[#allocation7 + $0x18] sm:$0xff]  ;;  %v282_v4 = vld [vmem:[#allocation5] sm:$0xff]  ;;  %s502_s13 = sshll.u32 %s803_s22, 4  ;;  %s384_s6 = sshll.u32 %s277_s12, 4  ;;  %s385_s6 = int_to_ptr.vmem [resolvable:$true] %s384_s6 }
  0x31   : > { %507 = vmatpush.msra.mxu3 %v329_v3  ;;  %352 = vmatpush.msra.mxu1 %v329_v3  ;;  %v281_v5 = vld [vmem:[%s240_s28 + $0x8] sm:$0xff]  ;;  %v280_v6 = vld [vmem:[%s240_s28] sm:$0xff]  ;;  %s383_s30 = scalar_lea.hbm %s953_s5, %s502_s13  ;;  %s372_s26 = scalar_lea.sflag [#allocation4], %s887_s8 }
  0x32   : > { %504 = vmatpush.msra.mxu2 %v284_v1  ;;  %310 = vmatpush.msra.mxu0 %v284_v1  ;;  %v328_v7 = vld [vmem:[#allocation7 + $0x10] sm:$0xff]  ;;  %v327_v8 = vld [vmem:[#allocation7 + $0x8] sm:$0xff]  ;;  %v326_v9 = vld [vmem:[#allocation7] sm:$0xff]  ;;  %s386_s7 = sshll.u32 %s383_s30, 4  ;;  %s694_s24 = scalar_lea.hbm %s953_s5, 32  ;;  %s387_s7 = int_to_ptr.hbm [resolvable:$true] %s386_s7 }
  0x33   : > { %508 = vmatpush.msra.mxu3 %v328_v7  ;;  %353 = vmatpush.msra.mxu1 %v328_v7  ;;  %v582_v10 = vld [vmem:[%s950_s2] ss:$0 sm:$0xff]  ;;  %s688_s10 = sshra.s32 %s387_s7, 4  ;;  %s689_s10 = int_to_ptr.hbm [resolvable:$true] %s688_s10 }
  0x34   : > { %505 = vmatpush.msra.mxu2 %v283_v2  ;;  %311 = vmatpush.msra.mxu0 %v283_v2  ;;  %v583_v19 = vld [vmem:[%s952_s4] ss:$0 sm:$0xff]  ;;  %s690_s22 = scalar_lea.hbm %s689_s10, 16  ;;  %p695_p11 = scmp.lt.s32.totalorder %s689_s10, %s953_s5 }
  0x35   : > { %509 = vmatpush.msra.mxu3 %v327_v8  ;;  %354 = vmatpush.msra.mxu1 %v327_v8  ;;  %p691_p1 = scmp.ne.s32.totalorder %s689_s10, %s690_s22  ;;  %p696_p2 = scmp.lt.s32.totalorder %s694_s24, %s690_s22 }
  0x36   : > { %506 = vmatpush.msra.mxu2 %v282_v4  ;;  %312 = vmatpush.msra.mxu0 %v282_v4 }
  0x37   : > { %493 = vmatmul.msk.f32.vlgmr.msra.gmra.mxu2 %vm290_vm0, %v281_v5  ;;  %492 = vmatmul.msk.f32.vlgmr.msra.gmra.mxu0 %vm290_vm0, %v280_v6  ;;  %p692_p4 = pnand %p691_p1, %p854_p3  ;;  %p697_p9 = por %p696_p2, %p695_p11 }
  0x38   : > { %510 = vmatpush.msra.mxu3 %v326_v9  ;;  %355 = vmatpush.msra.mxu1 %v326_v9 }
  0x39   : > { %p693_p8 = pneg %p692_p4 }
  0x3b   : > { %p698_p10 = pnand %p697_p9, %p693_p8 }
  0xb4   : > { %v314_v11 = vpop.f32.mrf.mxu0 }
  0xb5   : > { %v315_v12 = vadd.f32 %v582_v10, %v314_v11 }
  0xb7   : > { %v322_v13 = vmul.f32 0.01, %v315_v12  ;;  %vm320_vm1 = vcmp.gt.f32.partialorder %v315_v12, 0.0 }
  0xb9   : > { %v324_v14 = vsel %vm320_vm1, %v315_v12, %v322_v13 }
  0xba   : > { %v317_v15 = vpop.f32.mrf.mxu2  ;;  %494 = vmatmul.msk.f32.vlgmr.msra.gmra.mxu1 %vm290_vm0, %v324_v14 }
  0xbb   : > { %v318_v16 = vadd.f32 %v582_v10, %v317_v15 }
  0xbd   : > { %v323_v17 = vmul.f32 0.01, %v318_v16  ;;  %vm321_vm2 = vcmp.gt.f32.partialorder %v318_v16, 0.0 }
  0xbf   : > { %v325_v18 = vsel %vm321_vm2, %v318_v16, %v323_v17 }
  0xc0   : > { %495 = vmatmul.msk.f32.vlgmr.msra.gmra.mxu3 %vm290_vm0, %v325_v18 }
 0x137   : > { %v357_v20 = vpop.f32.mrf.mxu1 }
 0x138   : > { %v358_v21 = vadd.f32 %v583_v19, %v357_v20 }
 0x13a   : > { %vm363_vm3 = vcmp.gt.f32.partialorder %v358_v21, 0.0  ;;  %v365_v22 = vmul.f32 0.1, %v358_v21 }
 0x13c   : > { %v367_v23 = vsel %vm363_vm3, %v358_v21, %v365_v22 }
 0x13d   : > { %369 = vst.msk [vmem:[%s277_s12] sm:$0xff] %vm290_vm0, %v367_v23 }
 0x143   : > { %v360_v24 = vpop.f32.mrf.mxu3 }
 0x144   : > { %v361_v25 = vadd.f32 %v583_v19, %v360_v24 }
 0x146   : > { %vm364_vm4 = vcmp.gt.f32.partialorder %v361_v25, 0.0  ;;  %v366_v26 = vmul.f32 0.1, %v361_v25 }
 0x148   : > { %v368_v27 = vsel %vm364_vm4, %v361_v25, %v366_v26 }
 0x149   : > { %370 = vst.msk [vmem:[%s277_s12 + $0x8] sm:$0xff] %vm290_vm0, %v368_v27 }
 0x14a   : > { %701 = shalt.err (!%p698_p10)
}
 0x14b   : > { %s750_s8 = smov 128   ;;  %s751_s9 = smov 8  }
 0x14c   : > { %521 = dma.vmem_to_hbm [thread:$0]  (%p854_p3), %s385_s6, 256, %s387_s7, %s372_s26, %s750_s8, %s750_s8, %s751_s9  }
 0x14d PF: > { %s401_s12 = sand.u32 1, %s732_s18   ;;  %p961_p12 = scmp.ge.s32.totalorder %s744_s21, 2 }
 0x14e   : > { %s402_s13 = scalar_lea.sflag [#allocation4], %s401_s12 }
 0x14f   : > { %p535_p13 = pnand %p961_p12, %p817_p6 }
 0x151   : > { %p536_p0 = pneg %p535_p13 }
 0x153   : > { %727 = dma.done.wait (%p536_p0), %s402_s13, 256  }
 0x154   : > { %729 = vsyncadd (%p536_p0), %s402_s13, 4294967040  ;;  %p19_p5 = scmp.ge.s32.totalorder %s844_s14, 4   ;;  %s962_s18 = smov %s736_s19 }
 0x155   : > { %s963_s19 = smov %s740_s20  ;;  %s964_s20 = smov %s860_s23 }
 0x156   : > { %s965_s21 = smov %s844_s14  ;;  %21 = sbr.rel (!%p19_p5) target bundleno = 6 (0x6), region = 93 }
 0x15b   :  { %408 = vsyncpa [#allocation3], 1 }
 0x15c   :  { %410 = vsyncpa [#allocation3 + $0x1], 1 }
 0x15d   :  { %411 = vsyncpa [#allocation6], 1 }
 0x15e   :  { %412 = vsyncpa [#allocation4], 1 }
 0x15f   :  { %414 = vsyncpa [#allocation4 + $0x1], 1 }

</bundles_post_ra>
